<compile_context>
chip_gen: v7x
topology: tpu7x:2x2x1
jax: 0.10.0
libtpu: 0.0.40
codegen_flags: <defaults>
</compile_context>

<pallas_src>
import functools

import jax
import jax.numpy as jnp
from jax import lax
from jax.experimental import pallas as pl
from jax.experimental.pallas import tpu as pltpu


def _round_up(a, b):
    return (a + b - 1) // b * b


def _conv_relu_kernel(w_ref, x_ref, o_ref):
    # w_ref : (C_out, C_in*K)  im2col-flattened conv weight (resident in VMEM)
    # x_ref : (C_in*K, TILE)   im2col columns; lane axis = output positions
    # o_ref : (C_out, TILE)    lane-dense output slab
    acc = jnp.dot(w_ref[...], x_ref[...], preferred_element_type=jnp.float32)
    o_ref[...] = jnp.maximum(acc, 0.0).astype(o_ref.dtype)  # fused ReLU (f32)


@functools.partial(jax.jit, static_argnames=("kernel_size", "tile_lanes"))
def encoder_forward(x, weight, kernel_size, tile_lanes=4096):
    """JAX/Pallas equivalent of Encoder.forward: Conv1d(no bias, stride=K//2) + ReLU."""
    if x.ndim == 2:                      # matches torch.unsqueeze(x, dim=1)
        x = x[:, None, :]
    B, C_in, L = x.shape
    C_out, C_in_w, K = weight.shape
    assert C_in_w == C_in and K == kernel_size
    stride = K // 2
    assert K == 2 * stride, "implemented for even kernel_size (stride = K // 2)"
    L_out = (L - K) // stride + 1
    n_chunks = L_out + 1
    assert n_chunks * stride <= L

    out_dtype = x.dtype
    compute_dtype = jnp.bfloat16         # halve HBM bytes; MXU still accumulates in f32

    # ---- wrapper layout plumbing (cast FIRST so every materialized temp is bf16;
    #      the whole forward is one jit so XLA fuses cast/slice/concat/transpose/pad
    #      into a single producer pass) ---------------------------------------------
    xb = x.astype(compute_dtype)
    wb = weight.astype(compute_dtype)
    w_flat = wb.reshape(C_out, C_in * K)                       # (C_in-major, K-minor)

    # Non-overlapping chunk view, then im2col windows:
    #   xw[b, c, j, t] = x[b, c, j*stride + t],  t in [0, K)
    xc = xb[:, :, :n_chunks * stride].reshape(B, C_in, n_chunks, stride)
    xw = jnp.concatenate([xc[:, :, :L_out, :], xc[:, :, 1:, :]], axis=-1)

    CK = C_in * K
    tile_lanes = max(128, (tile_lanes // 128) * 128)
    cost = pl.CostEstimate(
        flops=2 * C_out * CK * B * L_out,
        transcendentals=0,
        bytes_accessed=2 * (B * L_out * CK + C_out * CK)
        + B * C_out * L_out * jnp.dtype(out_dtype).itemsize,
    )

    if L_out >= 128 and L_out % 128 == 0:
        # ---- direct-NCL path: no XLA transpose of the (dominant) output ----------
        xcol = xw.transpose(0, 1, 3, 2).reshape(B, CK, L_out)   # (B, C_in*K, L_out)
        tl = min(tile_lanes, L_out)
        n_lt = pl.cdiv(L_out, tl)
        if B == 1 and n_lt == 1 and L_out >= 256:
            tl = _round_up(pl.cdiv(L_out, 2), 128)              # >=2 tiles for v7x's 2 TCs
            n_lt = pl.cdiv(L_out, tl)
        return pl.pallas_call(
            _conv_relu_kernel,
            out_shape=jax.ShapeDtypeStruct((B, C_out, L_out), out_dtype),
            grid=(B, n_lt),
            in_specs=[
                pl.BlockSpec((C_out, CK), lambda b, lt: (0, 0)),          # weight (resident)
                pl.BlockSpec((None, CK, tl), lambda b, lt: (b, 0, lt)),   # im2col columns
            ],
            out_specs=pl.BlockSpec((None, C_out, tl), lambda b, lt: (b, 0, lt)),
            compiler_params=pltpu.CompilerParams(
                dimension_semantics=("parallel", "parallel"),
                vmem_limit_bytes=32 * 1024 * 1024,
            ),
            cost_estimate=cost,
        )(w_flat, xcol)

    # ---- flattened-lane path: lane axis = (batch, L_out) folded -> dense stores
    #      even when L_out is not a multiple of 128; one fused re-view to NCL at end.
    xcol = xw.transpose(1, 3, 0, 2).reshape(CK, B * L_out)
    N = B * L_out
    N128 = _round_up(N, 128)                 # keep padding waste < 128 lanes
    if N128 != N:
        xcol = jnp.pad(xcol, ((0, 0), (0, N128 - N)))
    tn = min(tile_lanes, N128)
    if tn == N128 and N128 >= 256:           # ensure >=2 lane tiles so both v7x TCs get work
        tn = _round_up(pl.cdiv(N128, 2), 128)
    grid_n = pl.cdiv(N128, tn)               # boundary tile (if any) is masked by Pallas

    out_flat = pl.pallas_call(
        _conv_relu_kernel,
        out_shape=jax.ShapeDtypeStruct((C_out, N128), out_dtype),
        grid=(grid_n,),
        in_specs=[
            pl.BlockSpec((C_out, CK), lambda n: (0, 0)),        # weight (resident)
            pl.BlockSpec((CK, tn), lambda n: (0, n)),           # im2col columns
        ],
        out_specs=pl.BlockSpec((C_out, tn), lambda n: (0, n)),
        compiler_params=pltpu.CompilerParams(
            dimension_semantics=("parallel",),
            vmem_limit_bytes=32 * 1024 * 1024,
        ),
        cost_estimate=cost,
    )(w_flat, xcol)

    # Re-view to the PyTorch NCL layout (single fused XLA pass).
    return out_flat[:, :N].reshape(C_out, B, L_out).transpose(1, 0, 2)


if __name__ == "__main__":
    key = jax.random.PRNGKey(0)
    k1, k2, k3, k4 = jax.random.split(key, 4)

    def reference(x, w, stride):
        # Reference conv on the bf16-rounded values (matches the kernel's arithmetic
        # of exact bf16 products accumulated in f32), + ReLU.
        xr = x.astype(jnp.bfloat16).astype(jnp.float32)
        wr = w.astype(jnp.bfloat16).astype(jnp.float32)
        y = lax.conv_general_dilated(
            xr, wr, window_strides=(stride,), padding="VALID",
            dimension_numbers=("NCH", "OIH", "NCH"),
            precision=lax.Precision.HIGHEST)
        return jnp.maximum(y, 0.0)

    # Case 1: small shapes, 2-D input (exercises the unsqueeze + flattened-lane path).
    B, C_in, L, C_out, K = 2, 1, 64, 32, 8
    x1 = jax.random.normal(k1, (B, L), dtype=jnp.float32)
    w1 = jax.random.normal(k2, (C_out, C_in, K), dtype=jnp.float32) * 0.1
    out1 = jax.block_until_ready(encoder_forward(x1, w1, K))
    ref1 = reference(x1[:, None, :], w1, K // 2)
    assert out1.shape == (B, C_out, (L - K) // (K // 2) + 1)
    assert jnp.allclose(out1, ref1, atol=1e-4, rtol=1e-4)

    # Case 2: L_out multiple of 128 (exercises the direct-NCL output path).
    B, C_in, L, C_out, K = 2, 4, 516, 32, 8
    x2 = jax.random.normal(k3, (B, C_in, L), dtype=jnp.float32)
    w2 = jax.random.normal(k4, (C_out, C_in, K), dtype=jnp.float32) * 0.1
    out2 = jax.block_until_ready(encoder_forward(x2, w2, K))
    ref2 = reference(x2, w2, K // 2)
    assert out2.shape == (B, C_out, 128)
    assert jnp.allclose(out2, ref2, atol=1e-4, rtol=1e-4)

    print("KERNEL_OK")
</pallas_src>

<mosaic_0001>
module attributes {stable_mosaic.version = 11 : i64} {
  func.func @_conv_relu_kernel(%arg0: i32, %arg1: memref<32x8xbf16, #tpu.memory_space<vmem>>, %arg2: memref<8x128xbf16, #tpu.memory_space<vmem>>, %arg3: memref<32x128xf32, #tpu.memory_space<vmem>>) attributes {dimension_semantics = [#tpu.dimension_semantics<parallel>], iteration_bounds = array<i64: 1>, scalar_prefetch = 0 : i64, scratch_operands = 0 : i64, tpu.core_type = #tpu.core_type<tc>, window_params = [{pipeline_mode = #tpu.pipeline_mode<synchronous>, transform_indices = @transform_0, window_bounds = array<i64: 32, 8>}, {transform_indices = @transform_1, window_bounds = array<i64: 8, 128>}, {transform_indices = @transform_2, window_bounds = array<i64: 32, 128>}]} {
    %c0 = arith.constant 0 : index
    %c0_0 = arith.constant 0 : index
    %0 = vector.load %arg1[%c0, %c0_0] : memref<32x8xbf16, #tpu.memory_space<vmem>>, vector<32x8xbf16>
    %c0_1 = arith.constant 0 : index
    %c0_2 = arith.constant 0 : index
    %1 = vector.load %arg2[%c0_1, %c0_2] : memref<8x128xbf16, #tpu.memory_space<vmem>>, vector<8x128xbf16>
    %cst = arith.constant dense<0.000000e+00> : vector<32x128xf32>
    %2 = tpu.matmul %0, %1, %cst {dimension_numbers = #tpu.dot_dimension_numbers<[1], [0], [0], [1], [0, 0, 1, 1], [], []>} : vector<32x8xbf16>, vector<8x128xbf16>, vector<32x128xf32> -> vector<32x128xf32>
    %cst_3 = arith.constant 0.000000e+00 : f32
    %3 = vector.broadcast %cst_3 : f32 to vector<32x128xf32>
    %4 = arith.maximumf %2, %3 : vector<32x128xf32>
    %c0_4 = arith.constant 0 : index
    %c0_5 = arith.constant 0 : index
    %5 = vector.load %arg3[%c0_4, %c0_5] : memref<32x128xf32, #tpu.memory_space<vmem>>, vector<32x128xf32>
    tpu.vector_store %arg3[%c0_4, %c0_5], %4 {strides = array<i32>} : memref<32x128xf32, #tpu.memory_space<vmem>>, vector<32x128xf32>,
    return
  }
  func.func @transform_0(%arg0: i32) -> (i32, i32) {
    %c0_i32 = arith.constant 0 : i32
    %c0_i32_0 = arith.constant 0 : i32
    %c0_i32_1 = arith.constant 0 : i32
    return %c0_i32, %c0_i32_0 : i32, i32
  }
  func.func @transform_1(%arg0: i32) -> (i32, i32) {
    %c0_i32 = arith.constant 0 : i32
    %c0_i32_0 = arith.constant 0 : i32
    return %c0_i32, %arg0 : i32, i32
  }
  func.func @transform_2(%arg0: i32) -> (i32, i32) {
    %c0_i32 = arith.constant 0 : i32
    %c0_i32_0 = arith.constant 0 : i32
    return %c0_i32, %arg0 : i32, i32
  }
}

</mosaic_0001>

<bundles_post_ra>
// kernel: encoder_forward.1
= control target key start
LH: loop header
LB: loop body
LE: loop exit
PB: predicated region body
PF: predicated region fallthrough
CT: control target
= control target key end

     0   :  { %vm34_vm0 = vcmask 1043456   ;;  %vm27_vm1 = vcmask 64512   ;;  %s151_s1 = inlined_call_operand.vmem [shape: bf16[8,128], index: 1, kind: input, shape index: {}]   ;;  %s152_s0 = inlined_call_operand.vmem [shape: bf16[32,8], index: 0, kind: input, shape index: {}]   ;;  %s153_s2 = inlined_call_operand.vmem [shape: f32[32,128], index: 2, kind: output, shape index: {}]  }
   0x1   :  { %v16_v0 = vld [vmem:[%s151_s1] sm:$0xf]  ;;  %v114_v3 = vld [vmem:[%s152_s0 + $0x8] sm:$0xff]  }
   0x2   :  { %112 = vmatprep.subr.msk.bf16.mxu0 %vm34_vm0, %v16_v0  ;;  %v36_v1 = vsel %vm34_vm0, %v16_v0, 0  ;;  %v113_v2 = vld [vmem:[%s152_s0] sm:$0xff]  }
   0x3   :  { %107 = vmatpush3.bf16.msra.mxu0 %v36_v1  ;;  %108 = vmatprep.mubr.msk.bf16.mxu0 %vm27_vm1, %v113_v2 }
   0x6   :  { %109 = vmatmul.mubr.msk.bf16.vlgmr.msra.gmra.mrb[0].mxu0 %vm27_vm1, %v114_v3 }
  0xd9   :  { %v110_v4 = vpop.f32.mrb[0].mxu0 }
  0xda   :  { %v89_v5 = vmax.f32 %v110_v4, 0.0  ;;  %v72_v6 = vpop.f32.mrb[1].mxu0 }
  0xdb   :  { %v87_v7 = vmax.f32 %v72_v6, 0.0  ;;  %v111_v8 = vpop.f32.mrb[2].mxu0 }
  0xdc   :  { %93 = vst [vmem:[%s153_s2 + $0x10] sm:$0xff] %v89_v5  ;;  %v90_v9 = vmax.f32 %v111_v8, 0.0  ;;  %v75_v10 = vpop.f32.mrb[3].mxu0 }
  0xdd   :  { %91 = vst [vmem:[%s153_s2] sm:$0xff] %v87_v7  ;;  %v88_v11 = vmax.f32 %v75_v10, 0.0 }
  0xde   :  { %94 = vst [vmem:[%s153_s2 + $0x18] sm:$0xff] %v90_v9 }
  0xdf   :  { %92 = vst [vmem:[%s153_s2 + $0x8] sm:$0xff] %v88_v11 }

</bundles_post_ra>
